<compile_context>
chip_gen: v7x
topology: tpu7x:2x2x1
jax: 0.10.0
libtpu: 0.0.40
codegen_flags: <defaults>
</compile_context>

<pallas_src>
import jax
import jax.numpy as jnp
from jax import lax
from jax.experimental import pallas as pl
from jax.experimental.pallas import tpu as pltpu


def _round_up(n, m):
    return ((n + m - 1) // m) * m


def mlp_kernel(x_ref, w1_ref, b1_ref, w2_ref, b2_ref, w3_ref, b3_ref,
               wo_ref, bo_ref, o_ref):
    """Fused 4-layer MLP, batch-in-lanes.

    x_ref : [TB, 26] f32   (one block of x in its natural batch-major layout)
    wN_ref: [out, in] bf16 (PyTorch-native layout; wo zero-padded to 8 rows)
    bN_ref: [out, 1]  f32  (bo zero-padded to 8 rows)
    o_ref : [8, TB]   f32  (batch in the lane dim -> lane-dense stores)
    """
    x = x_ref[...].astype(jnp.bfloat16)                      # [TB, 26]

    # Layer 1: contract the feature axis of both operands ("NT" matmul, as in
    # flash attention's q.k^T).  Result is [32, TB]: batch-in-lanes from here
    # on, with no wrapper-side transpose/pad pass over x.
    nt_dims = (((1,), (1,)), ((), ()))
    h = lax.dot_general(w1_ref[...], x, nt_dims,
                        preferred_element_type=jnp.float32) + b1_ref[...]
    h = jnp.maximum(h, 0.0).astype(jnp.bfloat16)             # [32, TB]

    h = jnp.dot(w2_ref[...], h, preferred_element_type=jnp.float32) + b2_ref[...]
    h = jnp.maximum(h, 0.0).astype(jnp.bfloat16)

    h = jnp.dot(w3_ref[...], h, preferred_element_type=jnp.float32) + b3_ref[...]
    h = jnp.maximum(h, 0.0).astype(jnp.bfloat16)

    o_ref[...] = (jnp.dot(wo_ref[...], h, preferred_element_type=jnp.float32)
                  + bo_ref[...]).astype(o_ref.dtype)         # [8, TB]


def net_forward(x, params, *, tb=8192):
    """x: [B, 26] fp32.  params: PyTorch-layout weights [out, in], biases [out]."""
    B, f_in = x.shape
    assert f_in == 26

    # Batch tile: multiple of 256 (v6e/v7x MXU width), capped at ceil(B/2)
    # rounded up so the grid keeps >=2 parallel steps whenever B > 256
    # (both v7x TensorCores busy).  Tail blocks are handled by Pallas boundary
    # semantics; padded lanes are garbage but independent and sliced off below.
    tb_eff = min(_round_up(tb, 256), _round_up(pl.cdiv(B, 2), 256))
    b_pad = _round_up(B, tb_eff)
    grid = (b_pad // tb_eff,)

    f32, bf16 = jnp.float32, jnp.bfloat16
    w1 = params["w1"].astype(bf16)                                   # [32, 26]
    w2 = params["w2"].astype(bf16)                                   # [32, 32]
    w3 = params["w3"].astype(bf16)                                   # [32, 32]
    # Pad the output layer 7 -> 8 rows for full-vreg stores (extra row is zero).
    wo = jnp.zeros((8, 32), bf16).at[:7, :].set(params["wo"].astype(bf16))
    b1 = params["b1"].reshape(-1, 1).astype(f32)
    b2 = params["b2"].reshape(-1, 1).astype(f32)
    b3 = params["b3"].reshape(-1, 1).astype(f32)
    bo = jnp.zeros((8, 1), f32).at[:7, :].set(
        params["bo"].reshape(-1, 1).astype(f32))

    weight_bytes = sum(int(a.size) * a.dtype.itemsize
                       for a in (w1, w2, w3, wo, b1, b2, b3, bo))
    cost = pl.CostEstimate(
        flops=2 * b_pad * (26 * 32 + 32 * 32 + 32 * 32 + 32 * 8),
        transcendentals=0,
        bytes_accessed=b_pad * 26 * 4 + b_pad * 8 * 4 + weight_bytes,
    )

    # Constant index_map -> weights/biases stay resident, not re-DMA'd per step.
    const_spec = lambda a: pl.BlockSpec(a.shape, lambda i: (0, 0))

    out_t = pl.pallas_call(
        mlp_kernel,
        out_shape=jax.ShapeDtypeStruct((8, b_pad), f32),
        grid_spec=pl.GridSpec(
            grid=grid,
            in_specs=[
                pl.BlockSpec((tb_eff, f_in), lambda i: (i, 0)),
                const_spec(w1), const_spec(b1),
                const_spec(w2), const_spec(b2),
                const_spec(w3), const_spec(b3),
                const_spec(wo), const_spec(bo),
            ],
            out_specs=pl.BlockSpec((8, tb_eff), lambda i: (0, i)),
        ),
        compiler_params=pltpu.CompilerParams(
            dimension_semantics=("parallel",),
            vmem_limit_bytes=32 * 1024 * 1024),
        cost_estimate=cost,
    )(x, w1, b1, w2, b2, w3, b3, wo, bo)

    # Only a tiny [8, B] slab comes back feature-major; slicing/transposing it is
    # negligible compared to the (now removed) relayout pass over x.
    return out_t[:7, :B].T                                            # [B, 7]


def init_params(key):
    """Deterministic init mimicking nn.Linear default (uniform +/- 1/sqrt(fan_in)).

    Weights kept in PyTorch-native [out, in] layout; biases are [out].
    """
    dims = [(26, 32), (32, 32), (32, 32), (32, 7)]
    names = ["1", "2", "3", "o"]
    params = {}
    for (fan_in, fan_out), name in zip(dims, names):
        key, kw, kb = jax.random.split(key, 3)
        bound = 1.0 / jnp.sqrt(fan_in)
        params[f"w{name}"] = jax.random.uniform(
            kw, (fan_out, fan_in), jnp.float32, -bound, bound)
        params[f"b{name}"] = jax.random.uniform(
            kb, (fan_out,), jnp.float32, -bound, bound)
    return params


if __name__ == "__main__":
    key = jax.random.PRNGKey(0)
    key, kx = jax.random.split(key)

    B = 8
    x = jax.random.normal(kx, (B, 26), jnp.float32)
    params = init_params(key)

    out = jax.block_until_ready(net_forward(x, params))

    # Reference in plain JAX (full f32; kernel uses bf16 MXU inputs -> loose tol).
    h = jnp.maximum(x @ params["w1"].T + params["b1"], 0.0)
    h = jnp.maximum(h @ params["w2"].T + params["b2"], 0.0)
    h = jnp.maximum(h @ params["w3"].T + params["b3"], 0.0)
    ref = h @ params["wo"].T + params["bo"]

    assert out.shape == (B, 7)
    assert jnp.allclose(out, ref, atol=5e-2, rtol=5e-2), (
        float(jnp.max(jnp.abs(out - ref))))

    print("KERNEL_OK")
</pallas_src>

<mosaic_0001>
module attributes {stable_mosaic.version = 11 : i64} {
  func.func @mlp_kernel(%arg0: i32, %arg1: memref<256x26xf32, #tpu.memory_space<vmem>>, %arg2: memref<32x26xbf16, #tpu.memory_space<vmem>>, %arg3: memref<32x1xf32, #tpu.memory_space<vmem>>, %arg4: memref<32x32xbf16, #tpu.memory_space<vmem>>, %arg5: memref<32x1xf32, #tpu.memory_space<vmem>>, %arg6: memref<32x32xbf16, #tpu.memory_space<vmem>>, %arg7: memref<32x1xf32, #tpu.memory_space<vmem>>, %arg8: memref<8x32xbf16, #tpu.memory_space<vmem>>, %arg9: memref<8x1xf32, #tpu.memory_space<vmem>>, %arg10: memref<8x256xf32, #tpu.memory_space<vmem>>) attributes {dimension_semantics = [#tpu.dimension_semantics<parallel>], iteration_bounds = array<i64: 1>, scalar_prefetch = 0 : i64, scratch_operands = 0 : i64, tpu.core_type = #tpu.core_type<tc>, window_params = [{transform_indices = @transform_0, window_bounds = array<i64: 256, 26>}, {pipeline_mode = #tpu.pipeline_mode<synchronous>, transform_indices = @transform_1, window_bounds = array<i64: 32, 26>}, {pipeline_mode = #tpu.pipeline_mode<synchronous>, transform_indices = @transform_2, window_bounds = array<i64: 32, 1>}, {pipeline_mode = #tpu.pipeline_mode<synchronous>, transform_indices = @transform_3, window_bounds = array<i64: 32, 32>}, {pipeline_mode = #tpu.pipeline_mode<synchronous>, transform_indices = @transform_4, window_bounds = array<i64: 32, 1>}, {pipeline_mode = #tpu.pipeline_mode<synchronous>, transform_indices = @transform_5, window_bounds = array<i64: 32, 32>}, {pipeline_mode = #tpu.pipeline_mode<synchronous>, transform_indices = @transform_6, window_bounds = array<i64: 32, 1>}, {pipeline_mode = #tpu.pipeline_mode<synchronous>, transform_indices = @transform_7, window_bounds = array<i64: 8, 32>}, {pipeline_mode = #tpu.pipeline_mode<synchronous>, transform_indices = @transform_8, window_bounds = array<i64: 8, 1>}, {transform_indices = @transform_9, window_bounds = array<i64: 8, 256>}]} {
    %c0 = arith.constant 0 : index
    %c0_0 = arith.constant 0 : index
    %0 = vector.load %arg1[%c0, %c0_0] : memref<256x26xf32, #tpu.memory_space<vmem>>, vector<256x26xf32>
    %1 = arith.truncf %0 : vector<256x26xf32> to vector<256x26xbf16>
    %c0_1 = arith.constant 0 : index
    %c0_2 = arith.constant 0 : index
    %2 = vector.load %arg2[%c0_1, %c0_2] : memref<32x26xbf16, #tpu.memory_space<vmem>>, vector<32x26xbf16>
    %cst = arith.constant dense<0.000000e+00> : vector<32x256xf32>
    %3 = tpu.matmul %2, %1, %cst {dimension_numbers = #tpu.dot_dimension_numbers<[1], [1], [0], [0], [0, 0, 1, 0], [], []>} : vector<32x26xbf16>, vector<256x26xbf16>, vector<32x256xf32> -> vector<32x256xf32>
    %c0_3 = arith.constant 0 : index
    %c0_4 = arith.constant 0 : index
    %4 = vector.load %arg3[%c0_3, %c0_4] : memref<32x1xf32, #tpu.memory_space<vmem>>, vector<32x1xf32>
    %5 = vector.broadcast %4 : vector<32x1xf32> to vector<32x256xf32>
    %6 = arith.addf %3, %5 : vector<32x256xf32>
    %cst_5 = arith.constant 0.000000e+00 : f32
    %7 = vector.broadcast %cst_5 : f32 to vector<32x256xf32>
    %8 = arith.maximumf %6, %7 : vector<32x256xf32>
    %9 = arith.truncf %8 : vector<32x256xf32> to vector<32x256xbf16>
    %c0_6 = arith.constant 0 : index
    %c0_7 = arith.constant 0 : index
    %10 = vector.load %arg4[%c0_6, %c0_7] : memref<32x32xbf16, #tpu.memory_space<vmem>>, vector<32x32xbf16>
    %cst_8 = arith.constant dense<0.000000e+00> : vector<32x256xf32>
    %11 = tpu.matmul %10, %9, %cst_8 {dimension_numbers = #tpu.dot_dimension_numbers<[1], [0], [0], [1], [0, 0, 1, 1], [], []>} : vector<32x32xbf16>, vector<32x256xbf16>, vector<32x256xf32> -> vector<32x256xf32>
    %c0_9 = arith.constant 0 : index
    %c0_10 = arith.constant 0 : index
    %12 = vector.load %arg5[%c0_9, %c0_10] : memref<32x1xf32, #tpu.memory_space<vmem>>, vector<32x1xf32>
    %13 = vector.broadcast %12 : vector<32x1xf32> to vector<32x256xf32>
    %14 = arith.addf %11, %13 : vector<32x256xf32>
    %cst_11 = arith.constant 0.000000e+00 : f32
    %15 = vector.broadcast %cst_11 : f32 to vector<32x256xf32>
    %16 = arith.maximumf %14, %15 : vector<32x256xf32>
    %17 = arith.truncf %16 : vector<32x256xf32> to vector<32x256xbf16>
    %c0_12 = arith.constant 0 : index
    %c0_13 = arith.constant 0 : index
    %18 = vector.load %arg6[%c0_12, %c0_13] : memref<32x32xbf16, #tpu.memory_space<vmem>>, vector<32x32xbf16>
    %cst_14 = arith.constant dense<0.000000e+00> : vector<32x256xf32>
    %19 = tpu.matmul %18, %17, %cst_14 {dimension_numbers = #tpu.dot_dimension_numbers<[1], [0], [0], [1], [0, 0, 1, 1], [], []>} : vector<32x32xbf16>, vector<32x256xbf16>, vector<32x256xf32> -> vector<32x256xf32>
    %c0_15 = arith.constant 0 : index
    %c0_16 = arith.constant 0 : index
    %20 = vector.load %arg7[%c0_15, %c0_16] : memref<32x1xf32, #tpu.memory_space<vmem>>, vector<32x1xf32>
    %21 = vector.broadcast %20 : vector<32x1xf32> to vector<32x256xf32>
    %22 = arith.addf %19, %21 : vector<32x256xf32>
    %cst_17 = arith.constant 0.000000e+00 : f32
    %23 = vector.broadcast %cst_17 : f32 to vector<32x256xf32>
    %24 = arith.maximumf %22, %23 : vector<32x256xf32>
    %25 = arith.truncf %24 : vector<32x256xf32> to vector<32x256xbf16>
    %c0_18 = arith.constant 0 : index
    %c0_19 = arith.constant 0 : index
    %26 = vector.load %arg8[%c0_18, %c0_19] : memref<8x32xbf16, #tpu.memory_space<vmem>>, vector<8x32xbf16>
    %cst_20 = arith.constant dense<0.000000e+00> : vector<8x256xf32>
    %27 = tpu.matmul %26, %25, %cst_20 {dimension_numbers = #tpu.dot_dimension_numbers<[1], [0], [0], [1], [0, 0, 1, 1], [], []>} : vector<8x32xbf16>, vector<32x256xbf16>, vector<8x256xf32> -> vector<8x256xf32>
    %c0_21 = arith.constant 0 : index
    %c0_22 = arith.constant 0 : index
    %28 = vector.load %arg9[%c0_21, %c0_22] : memref<8x1xf32, #tpu.memory_space<vmem>>, vector<8x1xf32>
    %29 = vector.broadcast %28 : vector<8x1xf32> to vector<8x256xf32>
    %30 = arith.addf %27, %29 : vector<8x256xf32>
    %c0_23 = arith.constant 0 : index
    %c0_24 = arith.constant 0 : index
    %31 = vector.load %arg10[%c0_23, %c0_24] : memref<8x256xf32, #tpu.memory_space<vmem>>, vector<8x256xf32>
    tpu.vector_store %arg10[%c0_23, %c0_24], %30 {strides = array<i32>} : memref<8x256xf32, #tpu.memory_space<vmem>>, vector<8x256xf32>,
    return
  }
  func.func @transform_0(%arg0: i32) -> (i32, i32) {
    %c0_i32 = arith.constant 0 : i32
    %c0_i32_0 = arith.constant 0 : i32
    return %arg0, %c0_i32 : i32, i32
  }
  func.func @transform_1(%arg0: i32) -> (i32, i32) {
    %c0_i32 = arith.constant 0 : i32
    %c0_i32_0 = arith.constant 0 : i32
    %c0_i32_1 = arith.constant 0 : i32
    return %c0_i32, %c0_i32_0 : i32, i32
  }
  func.func @transform_2(%arg0: i32) -> (i32, i32) {
    %c0_i32 = arith.constant 0 : i32
    %c0_i32_0 = arith.constant 0 : i32
    %c0_i32_1 = arith.constant 0 : i32
    return %c0_i32, %c0_i32_0 : i32, i32
  }
  func.func @transform_3(%arg0: i32) -> (i32, i32) {
    %c0_i32 = arith.constant 0 : i32
    %c0_i32_0 = arith.constant 0 : i32
    %c0_i32_1 = arith.constant 0 : i32
    return %c0_i32, %c0_i32_0 : i32, i32
  }
  func.func @transform_4(%arg0: i32) -> (i32, i32) {
    %c0_i32 = arith.constant 0 : i32
    %c0_i32_0 = arith.constant 0 : i32
    %c0_i32_1 = arith.constant 0 : i32
    return %c0_i32, %c0_i32_0 : i32, i32
  }
  func.func @transform_5(%arg0: i32) -> (i32, i32) {
    %c0_i32 = arith.constant 0 : i32
    %c0_i32_0 = arith.constant 0 : i32
    %c0_i32_1 = arith.constant 0 : i32
    return %c0_i32, %c0_i32_0 : i32, i32
  }
  func.func @transform_6(%arg0: i32) -> (i32, i32) {
    %c0_i32 = arith.constant 0 : i32
    %c0_i32_0 = arith.constant 0 : i32
    %c0_i32_1 = arith.constant 0 : i32
    return %c0_i32, %c0_i32_0 : i32, i32
  }
  func.func @transform_7(%arg0: i32) -> (i32, i32) {
    %c0_i32 = arith.constant 0 : i32
    %c0_i32_0 = arith.constant 0 : i32
    %c0_i32_1 = arith.constant 0 : i32
    return %c0_i32, %c0_i32_0 : i32, i32
  }
  func.func @transform_8(%arg0: i32) -> (i32, i32) {
    %c0_i32 = arith.constant 0 : i32
    %c0_i32_0 = arith.constant 0 : i32
    %c0_i32_1 = arith.constant 0 : i32
    return %c0_i32, %c0_i32_0 : i32, i32
  }
  func.func @transform_9(%arg0: i32) -> (i32, i32) {
    %c0_i32 = arith.constant 0 : i32
    %c0_i32_0 = arith.constant 0 : i32
    return %c0_i32, %arg0 : i32, i32
  }
}

</mosaic_0001>

<bundles_post_ra>
// kernel: tpu_custom_call.1
= control target key start
LH: loop header
LB: loop body
LE: loop exit
PB: predicated region body
PF: predicated region fallthrough
CT: control target
= control target key end

     0   :  { %vm120_vm0 = vcmask 211968   ;;  %v601_v7 = vmov 0   ;;  %s857_s0 = inlined_call_operand.vmem [shape: f32[8,26], index: 0, kind: input, shape index: {}]   ;;  %s858_s1 = inlined_call_operand.vmem [shape: bf16[32,26], index: 1, kind: input, shape index: {}]   ;;  %s859_s2 = inlined_call_operand.vmem [shape: f32[32,1], index: 2, kind: input, shape index: {}]   ;;  %s860_s3 = inlined_call_operand.vmem [shape: bf16[32,32], index: 3, kind: input, shape index: {}]   ;;  %s861_s4 = inlined_call_operand.vmem [shape: f32[32,1], index: 4, kind: input, shape index: {}]   ;;  %s862_s5 = inlined_call_operand.vmem [shape: bf16[32,32], index: 5, kind: input, shape index: {}]   ;;  %s863_s6 = inlined_call_operand.vmem [shape: f32[32,1], index: 6, kind: input, shape index: {}]   ;;  %s864_s7 = inlined_call_operand.vmem [shape: bf16[8,32], index: 7, kind: input, shape index: {}]   ;;  %s865_s8 = inlined_call_operand.vmem [shape: f32[8,1], index: 8, kind: input, shape index: {}]   ;;  %s866_s9 = inlined_call_operand.hbm [shape: f32[8,256], index: 9, kind: output, shape index: {}]  }
   0x1   :  { %v50_v0 = vld [vmem:[%s857_s0 + $0x80] sm:$0xff]  ;;  %v51_v1 = vld [vmem:[%s857_s0 + $0x88] sm:$0xff]  ;;  %v52_v5 = vld [vmem:[%s857_s0 + $0x90] sm:$0xff]  ;;  %569 = vset.pattern.permute.xlu0 %v601_v7  ;;  %570 = vset.pattern.permute.xlu1 %v601_v7 }
   0x2   :  { %v34_v2 = vld [vmem:[%s857_s0] sm:$0xff]  ;;  %v74_v3 = vpack.c.bf16 %v51_v1, %v50_v0  ;;  %v35_v4 = vld [vmem:[%s857_s0 + $0x8] sm:$0xff]  ;;  %v53_v6 = vld [vmem:[%s857_s0 + $0x98] sm:$0xff]  ;;  %317 = vmatprep.mubr.bf16.mxu1 %v601_v7 }
   0x3   :  { %v66_v8 = vpack.c.bf16 %v35_v4, %v34_v2  ;;  %v75_v9 = vpack.c.bf16 %v53_v6, %v52_v5  ;;  %v36_v10 = vld [vmem:[%s857_s0 + $0x10] sm:$0xff]  ;;  %v37_v11 = vld [vmem:[%s857_s0 + $0x18] sm:$0xff]  ;;  %v54_v14 = vld [vmem:[%s857_s0 + $0xa0] sm:$0xff] }
   0x4   :  { %559 = vmatprep.subr.msk.bf16.mxu0 %vm120_vm0, %v74_v3  ;;  %v67_v13 = vpack.c.bf16 %v37_v11, %v36_v10  ;;  %v55_v15 = vld [vmem:[%s857_s0 + $0xa8] sm:$0xff]  ;;  %v38_v16 = vld [vmem:[%s857_s0 + $0x20] sm:$0xff]  ;;  %v88_v23 = vld [vmem:[%s859_s2 + $0x10] sm:$0xff] }
   0x5   :  { %v128_v12 = vsel %vm120_vm0, %v66_v8, 0  ;;  %v39_v17 = vld [vmem:[%s857_s0 + $0x28] sm:$0xff]  ;;  %v76_v19 = vpack.c.bf16 %v55_v15, %v54_v14  ;;  %v699_v20 = vld [vmem:[%s858_s1] sm:$0xff]   ;;  %v56_v24 = vld [vmem:[%s857_s0 + $0xb0] sm:$0xff]  ;;  %102 = vperm.xlu1 %570, %v88_v23  }
   0x6   :  { %540 = vmatpush3.bf16.xpose.msra.mxu0 %v128_v12  ;;  %v131_v18 = vsel %vm120_vm0, %v67_v13, 0  ;;  %v68_v21 = vpack.c.bf16 %v39_v17, %v38_v16  ;;  %v86_v22 = vld [vmem:[%s859_s2] sm:$0xff]  ;;  %555 = vmatprep.mubr.msk.bf16.mxu0 %vm120_vm0, %v699_v20  ;;  %v57_v25 = vld [vmem:[%s857_s0 + $0xb8] sm:$0xff]  ;;  %v87_v26 = vld [vmem:[%s859_s2 + $0x8] sm:$0xff] }
   0x7   :  { %560 = vmatprep.subr.msk.bf16.mxu0 %vm120_vm0, %v75_v9  ;;  %92 = vperm.xlu0 %569, %v86_v22   ;;  %v89_v28 = vld [vmem:[%s859_s2 + $0x18] sm:$0xff]  ;;  %v40_v29 = vld [vmem:[%s857_s0 + $0x30] sm:$0xff]  ;;  %v244_v31 = vld [vmem:[%s861_s4] sm:$0xff]  ;;  %v77_v32 = vpack.c.bf16 %v57_v25, %v56_v24 }
   0x8   :  { %v134_v27 = vsel %vm120_vm0, %v68_v21, 0  ;;  %v41_v30 = vld [vmem:[%s857_s0 + $0x38] sm:$0xff] }
   0x9   :  { %107 = vperm.xlu1 %570, %v89_v28  }
   0xb   :  { %97 = vperm.xlu0 %569, %v87_v26  }
   0xe   :  { %542 = vmatpush3.bf16.xpose.msra.mxu0 %v131_v18 }
   0xf   :  { %561 = vmatprep.subr.msk.bf16.mxu0 %vm120_vm0, %v76_v19 }
  0x10   :  { %14 = vsyncpa [#allocation3], 0  ;;  %v245_v33 = vld [vmem:[%s861_s4 + $0x8] sm:$0xff]  ;;  %v69_v34 = vpack.c.bf16 %v41_v30, %v40_v29  ;;  %250 = vperm.xlu0 %569, %v244_v31   ;;  %v58_v35 = vld [vmem:[%s857_s0 + $0xc0] sm:$0xff]  ;;  %vm278_vm1 = vcmask 261120   ;;  %s602_s18 = smov [#allocation2]  }
  0x11   :  { %v59_v36 = vld [vmem:[%s857_s0 + $0xc8] sm:$0xff]  ;;  %v246_v37 = vld [vmem:[%s861_s4 + $0x10] sm:$0xff]  ;;  %255 = vperm.xlu1 %570, %v245_v33   ;;  %v247_v38 = vld [vmem:[%s861_s4 + $0x18] sm:$0xff] }
  0x12   :  { %v137_v39 = vsel %vm120_vm0, %v69_v34, 0  ;;  %v78_v40 = vpack.c.bf16 %v59_v36, %v58_v35  ;;  %v42_v41 = vld [vmem:[%s857_s0 + $0x40] sm:$0xff]  ;;  %v43_v42 = vld [vmem:[%s857_s0 + $0x48] sm:$0xff]  ;;  %v60_v46 = vld [vmem:[%s857_s0 + $0xd0] sm:$0xff] }
  0x13   :  { %v354_v43 = vld [vmem:[%s863_s6] sm:$0xff]  ;;  %v355_v44 = vld [vmem:[%s863_s6 + $0x8] sm:$0xff]  ;;  %v70_v45 = vpack.c.bf16 %v43_v42, %v42_v41  ;;  %v61_v47 = vld [vmem:[%s857_s0 + $0xd8] sm:$0xff] }
  0x14   :  { %260 = vperm.xlu0 %569, %v246_v37   ;;  %v356_v48 = vld [vmem:[%s863_s6 + $0x10] sm:$0xff]  ;;  %v357_v49 = vld [vmem:[%s863_s6 + $0x18] sm:$0xff]  ;;  %v79_v51 = vpack.c.bf16 %v61_v47, %v60_v46  ;;  %v460_v54 = vld [vmem:[%s865_s8] sm:$0xff]  ;;  %s518_s6 = sshll.u32 %s602_s18, 4  ;;  %s519_s6 = int_to_ptr.vmem [resolvable:$true] %s518_s6 }
  0x15   :  { %265 = vperm.xlu1 %570, %v247_v38   ;;  %v140_v50 = vsel %vm120_vm0, %v70_v45, 0  ;;  %v44_v52 = vld [vmem:[%s857_s0 + $0x50] sm:$0xff]  ;;  %v45_v53 = vld [vmem:[%s857_s0 + $0x58] sm:$0xff]  ;;  %v62_v56 = vld [vmem:[%s857_s0 + $0xe0] sm:$0xff]  ;;  %s577_s19 = scalar_lea.vmem %s519_s6, 256  ;;  %p582_p1 = scmp.lt.s32.totalorder %s519_s6, %s519_s6 }
  0x16   :  { %544 = vmatpush3.bf16.xpose.msra.mxu0 %v134_v27  ;;  %v71_v55 = vpack.c.bf16 %v45_v53, %v44_v52  ;;  %v63_v57 = vld [vmem:[%s857_s0 + $0xe8] sm:$0xff]  ;;  %v46_v60 = vld [vmem:[%s857_s0 + $0x60] sm:$0xff]  ;;  %v64_v63 = vld [vmem:[%s857_s0 + $0xf0] sm:$0xff]  ;;  %p578_p0 = scmp.ne.s32.totalorder %s519_s6, %s577_s19  ;;  %p583_p2 = scmp.lt.s32.totalorder %s577_s19, %s577_s19 }
  0x17   :  { %562 = vmatprep.subr.msk.bf16.mxu0 %vm120_vm0, %v77_v32  ;;  %v80_v59 = vpack.c.bf16 %v63_v57, %v62_v56  ;;  %v47_v61 = vld [vmem:[%s857_s0 + $0x68] sm:$0xff]  ;;  %v65_v0 = vld [vmem:[%s857_s0 + $0xf8] sm:$0xff]  ;;  %v48_v3 = vld [vmem:[%s857_s0 + $0x70] sm:$0xff] }
  0x18   :  { %360 = vperm.xlu0 %569, %v354_v43   ;;  %v143_v58 = vsel %vm120_vm0, %v71_v55, 0  ;;  %v72_v62 = vpack.c.bf16 %v47_v61, %v46_v60  ;;  %v81_v2 = vpack.c.bf16 %v65_v0, %v64_v63  ;;  %v49_v4 = vld [vmem:[%s857_s0 + $0x78] sm:$0xff]  ;;  %v572_v8 = vld [vmem:[%s858_s1 + $0x8] sm:$0xff]   ;;  %v573_v41 = vld [vmem:[%s860_s3] sm:$0xff]   ;;  %p584_p3 = por %p583_p2, %p582_p1 }
  0x19   :  { %365 = vperm.xlu1 %570, %v355_v44   ;;  %v73_v5 = vpack.c.bf16 %v49_v4, %v48_v3  ;;  %v574_v42 = vld [vmem:[%s860_s3 + $0x8] sm:$0xff]  }
  0x1a   :  { %v146_v1 = vsel %vm120_vm0, %v72_v62, 0  ;;  %p585_p4 = pnand %p584_p3, %p578_p0 }
  0x1b   :  { %v149_v6 = vsel %vm120_vm0, %v73_v5, 0 }
  0x1c   :  { %370 = vperm.xlu0 %569, %v356_v48  }
  0x1d   :  { %375 = vperm.xlu1 %570, %v357_v49  }
  0x1e   :  { %546 = vmatpush3.bf16.xpose.msra.mxu0 %v137_v39 }
  0x1f   :  { %563 = vmatprep.subr.msk.bf16.mxu0 %vm120_vm0, %v78_v40 }
  0x20   :  { %463 = vperm.xlu0 %569, %v460_v54  }
  0x26   :  { %548 = vmatpush3.bf16.xpose.msra.mxu0 %v140_v50 }
  0x27   :  { %564 = vmatprep.subr.msk.bf16.mxu0 %vm120_vm0, %v79_v51 }
  0x2e   :  { %550 = vmatpush3.bf16.xpose.msra.mxu0 %v143_v58 }
  0x2f   :  { %565 = vmatprep.subr.msk.bf16.mxu0 %vm120_vm0, %v80_v59 }
  0x36   :  { %552 = vmatpush3.bf16.xpose.msra.mxu0 %v146_v1 }
  0x37   :  { %566 = vmatprep.subr.msk.bf16.mxu0 %vm120_vm0, %v81_v2 }
  0x3e   :  { %554 = vmatpush3.bf16.xpose.msra.mxu0 %v149_v6 }
  0x45   :  { %556 = vmatmul.mubr.msk.bf16.vlgmr.msra.gmra.mrb[0].mxu0 %vm120_vm0, %v699_v20 }
  0x46   :  { %557 = vmatprep.mubr.msk.bf16.mxu0 %vm120_vm0, %v572_v8 }
  0x4d   :  { %558 = vmatmul.mubr.msk.bf16.gmra.mrb[4].mxu0 %vm120_vm0, %v572_v8 }
  0x84   :  { %v103_v18 = vpop.permute.xlu1 %102 }
  0x86   :  { %v93_v9 = vpop.permute.xlu0 %92 }
  0x88   :  { %v108_v29 = vpop.permute.xlu1 %107 }
  0x8a   :  { %v98_v13 = vpop.permute.xlu0 %97 }
  0x8f   :  { %v251_v43 = vpop.permute.xlu0 %250 }
  0x90   :  { %v256_v47 = vpop.permute.xlu1 %255 }
  0x93   :  { %v261_v58 = vpop.permute.xlu0 %260 }
  0x94   :  { %v266_v63 = vpop.permute.xlu1 %265 }
 0x118   :  { %v209_v10 = vpop.f32.mrb[0].mxu0 }
 0x119   :  { %v210_v11 = vadd.f32 %v209_v10, %v93_v9  ;;  %v211_v12 = vpop.f32.mrb[1].mxu0 }
 0x11a   :  { %v212_v14 = vadd.f32 %v211_v12, %v93_v9  ;;  %v213_v15 = vpop.f32.mrb[2].mxu0  ;;  %v575_v12 = vld [vmem:[%s862_s5] sm:$0xff]  }
 0x11b   :  { %v214_v16 = vadd.f32 %v213_v15, %v98_v13  ;;  %v215_v17 = vpop.f32.mrb[3].mxu0  ;;  %v228_v21 = vmax.f32 %v210_v11, 0.0 }
 0x11c   :  { %v216_v19 = vadd.f32 %v215_v17, %v98_v13  ;;  %v229_v23 = vmax.f32 %v212_v14, 0.0  ;;  %v576_v13 = vld [vmem:[%s862_s5 + $0x8] sm:$0xff]   ;;  %v361_v14 = vpop.permute.xlu0 %360 }
 0x11d   :  { %v230_v22 = vmax.f32 %v214_v16, 0.0 }
 0x11e   :  { %v231_v24 = vmax.f32 %v216_v19, 0.0 }
 0x11f   :  { %v236_v20 = vpack.c.bf16 %v230_v22, %v228_v21 }
 0x120   :  { %v219_v25 = vpop.f32.mrb[4].mxu0  ;;  %v237_v26 = vpack.c.bf16 %v231_v24, %v229_v23 }
 0x121   :  { %v220_v27 = vadd.f32 %v219_v25, %v103_v18  ;;  %v221_v28 = vpop.f32.mrb[5].mxu0 }
 0x122   :  { %v222_v30 = vadd.f32 %v221_v28, %v103_v18  ;;  %v223_v31 = vpop.f32.mrb[6].mxu0  ;;  %285 = vmatprep.subr.bf16.mxu1 %v237_v26  ;;  %v366_v18 = vpop.permute.xlu1 %365 }
 0x123   :  { %v224_v32 = vadd.f32 %v223_v31, %v108_v29  ;;  %v225_v33 = vpop.f32.mrb[7].mxu0  ;;  %286 = vmatpush1.bf16.msra.mxu1 %v236_v20  ;;  %v232_v35 = vmax.f32 %v220_v27, 0.0 }
 0x124   :  { %v226_v34 = vadd.f32 %v225_v33, %v108_v29  ;;  %v233_v37 = vmax.f32 %v222_v30, 0.0  ;;  %v371_v29 = vpop.permute.xlu0 %370 }
 0x125   :  { %v234_v36 = vmax.f32 %v224_v32, 0.0 }
 0x126   :  { %v235_v38 = vmax.f32 %v226_v34, 0.0  ;;  %v376_v33 = vpop.permute.xlu1 %375 }
 0x127   :  { %v238_v39 = vpack.c.bf16 %v234_v36, %v232_v35 }
 0x128   :  { %v239_v40 = vpack.c.bf16 %v235_v38, %v233_v37 }
 0x12a   :  { %287 = vmatprep.subr.bf16.mxu1 %v239_v40 }
 0x12b   :  { %288 = vmatpush1.bf16.msra.mxu1 %v238_v39 }
 0x12e   :  { %532 = vmatmul.mubr.msk.bf16.vlgmr.msra.gmra.mrb[0].mxu1 %vm278_vm1, %v573_v41 }
 0x12f   :  { %327 = vmatprep.mubr.bf16.mxu1 %v601_v7 }
 0x136   :  { %533 = vmatmul.mubr.msk.bf16.gmra.mrb[4].mxu1 %vm278_vm1, %v574_v42 }
 0x137   :  { %426 = vmatprep.mubr.bf16.mxu1 %v601_v7 }
 0x201   :  { %v319_v44 = vpop.f32.mrb[0].mxu1 }
 0x202   :  { %v320_v45 = vadd.f32 %v319_v44, %v251_v43  ;;  %v321_v46 = vpop.f32.mrb[1].mxu1 }
 0x203   :  { %v322_v48 = vadd.f32 %v321_v46, %v251_v43  ;;  %v323_v49 = vpop.f32.mrb[2].mxu1  ;;  %v464_v46 = vpop.permute.xlu0 %463 }
 0x204   :  { %v324_v50 = vadd.f32 %v323_v49, %v256_v47  ;;  %v325_v51 = vpop.f32.mrb[3].mxu1  ;;  %v338_v53 = vmax.f32 %v320_v45, 0.0  ;;  %v459_v45 = vld [vmem:[%s864_s7] sm:$0xf] }
 0x205   :  { %v326_v52 = vadd.f32 %v325_v51, %v256_v47  ;;  %v339_v55 = vmax.f32 %v322_v48, 0.0 }
 0x206   :  { %v340_v54 = vmax.f32 %v324_v50, 0.0 }
 0x207   :  { %v341_v56 = vmax.f32 %v326_v52, 0.0 }
 0x208   :  { %v346_v57 = vpack.c.bf16 %v340_v54, %v338_v53 }
 0x209   :  { %v347_v59 = vpack.c.bf16 %v341_v56, %v339_v55  ;;  %v329_v60 = vpop.f32.mrb[4].mxu1 }
 0x20a   :  { %v330_v61 = vadd.f32 %v329_v60, %v261_v58  ;;  %v331_v62 = vpop.f32.mrb[5].mxu1 }
 0x20b   :  { %v332_v0 = vadd.f32 %v331_v62, %v261_v58  ;;  %v333_v1 = vpop.f32.mrb[6].mxu1  ;;  %394 = vmatprep.subr.bf16.mxu1 %v347_v59 }
 0x20c   :  { %v334_v2 = vadd.f32 %v333_v1, %v266_v63  ;;  %v335_v3 = vpop.f32.mrb[7].mxu1  ;;  %395 = vmatpush1.bf16.msra.mxu1 %v346_v57  ;;  %v342_v5 = vmax.f32 %v330_v61, 0.0 }
 0x20d   :  { %v336_v4 = vadd.f32 %v335_v3, %v266_v63  ;;  %v343_v8 = vmax.f32 %v332_v0, 0.0 }
 0x20e   :  { %v344_v6 = vmax.f32 %v334_v2, 0.0 }
 0x20f   :  { %v345_v9 = vmax.f32 %v336_v4, 0.0 }
 0x210   :  { %v348_v10 = vpack.c.bf16 %v344_v6, %v342_v5 }
 0x211   :  { %v349_v11 = vpack.c.bf16 %v345_v9, %v343_v8 }
 0x213   :  { %396 = vmatprep.subr.bf16.mxu1 %v349_v11 }
 0x214   :  { %397 = vmatpush1.bf16.msra.mxu1 %v348_v10 }
 0x217   :  { %536 = vmatmul.mubr.msk.bf16.vlgmr.msra.gmra.mrb[8].mxu1 %vm278_vm1, %v575_v12 }
 0x218   :  { %436 = vmatprep.mubr.bf16.mxu1 %v601_v7 }
 0x21f   :  { %537 = vmatmul.mubr.msk.bf16.gmra.mrb[12].mxu1 %vm278_vm1, %v576_v13 }
 0x220   :  { %501 = vmatprep.mubr.bf16.mxu1 %v601_v7 }
 0x2ea   :  { %v428_v15 = vpop.f32.mrb[8].mxu1 }
 0x2eb   :  { %v429_v16 = vadd.f32 %v428_v15, %v361_v14  ;;  %v430_v17 = vpop.f32.mrb[9].mxu1 }
 0x2ec   :  { %v431_v19 = vadd.f32 %v430_v17, %v361_v14  ;;  %v432_v21 = vpop.f32.mrb[10].mxu1 }
 0x2ed   :  { %v433_v22 = vadd.f32 %v432_v21, %v366_v18  ;;  %v434_v23 = vpop.f32.mrb[11].mxu1  ;;  %v447_v20 = vmax.f32 %v429_v16, 0.0 }
 0x2ee   :  { %v435_v24 = vadd.f32 %v434_v23, %v366_v18  ;;  %v448_v26 = vmax.f32 %v431_v19, 0.0 }
 0x2ef   :  { %v449_v25 = vmax.f32 %v433_v22, 0.0 }
 0x2f0   :  { %v450_v27 = vmax.f32 %v435_v24, 0.0 }
 0x2f1   :  { %v455_v28 = vpack.c.bf16 %v449_v25, %v447_v20 }
 0x2f2   :  { %v456_v30 = vpack.c.bf16 %v450_v27, %v448_v26  ;;  %v438_v31 = vpop.f32.mrb[12].mxu1 }
 0x2f3   :  { %v439_v32 = vadd.f32 %v438_v31, %v371_v29  ;;  %v440_v7 = vpop.f32.mrb[13].mxu1 }
 0x2f4   :  { %v441_v34 = vadd.f32 %v440_v7, %v371_v29  ;;  %v442_v35 = vpop.f32.mrb[14].mxu1  ;;  %469 = vmatprep.subr.bf16.mxu1 %v456_v30 }
 0x2f5   :  { %v443_v36 = vadd.f32 %v442_v35, %v376_v33  ;;  %v444_v37 = vpop.f32.mrb[15].mxu1  ;;  %470 = vmatpush1.bf16.msra.mxu1 %v455_v28  ;;  %v451_v39 = vmax.f32 %v439_v32, 0.0 }
 0x2f6   :  { %v445_v38 = vadd.f32 %v444_v37, %v376_v33  ;;  %v452_v41 = vmax.f32 %v441_v34, 0.0 }
 0x2f7   :  { %v453_v40 = vmax.f32 %v443_v36, 0.0 }
 0x2f8   :  { %v454_v42 = vmax.f32 %v445_v38, 0.0 }
 0x2f9   :  { %v457_v43 = vpack.c.bf16 %v453_v40, %v451_v39 }
 0x2fa   :  { %v458_v44 = vpack.c.bf16 %v454_v42, %v452_v41 }
 0x2fc   :  { %471 = vmatprep.subr.bf16.mxu1 %v458_v44 }
 0x2fd   :  { %472 = vmatpush1.bf16.msra.mxu1 %v457_v43 }
 0x300   :  { %538 = vmatmul.mubr.msk.bf16.vlgmr.msra.gmra.mrb[16].mxu1 %vm278_vm1, %v459_v45 }
 0x3d3   :  { %v503_v47 = vpop.f32.mrb[16].mxu1 }
 0x3d4   :  { %v504_v48 = vadd.f32 %v503_v47, %v464_v46  ;;  %v505_v49 = vpop.f32.mrb[17].mxu1 }
 0x3d5   :  { %v506_v50 = vadd.f32 %v505_v49, %v464_v46  ;;  %v507_v51 = vpop.f32.mrb[18].mxu1 }
 0x3d6   :  { %510 = vst [vmem:[#allocation2] sm:$0xff] %v504_v48  ;;  %v508_v52 = vpop.f32.mrb[19].mxu1 }
 0x3d7   :  { %511 = vst [vmem:[#allocation2 + $0x8] sm:$0xff] %v506_v50 }
 0x3d8   :  { %588 = shalt.err (!%p585_p4)
}
 0x3d9   :  { %s589_s21 = scalar_lea.hbm %s866_s9, 256 }
 0x3da   :  { %p590_p5 = scmp.ne.s32.totalorder %s866_s9, %s589_s21  ;;  %p593_p6 = scmp.lt.u32.totalorder %s589_s21, %s866_s9 }
 0x3dc   :  { %p595_p7 = pnand %p593_p6, %p590_p5 }
 0x3de   :  { %598 = shalt.err (!%p595_p7)
}
 0x3df   :  { %521 = dma.vmem_to_hbm [thread:$0]  %s519_s6, 256, %s866_s9, [#allocation3]  }
 0x3e0   :  { %599 = dma.done.wait [#allocation3], 256  }
 0x3e1   :  { %600 = vsyncadd [#allocation3], 4294967040 }
 0x3e2   :  { %525 = vsyncpa [#allocation3], 1 }

</bundles_post_ra>
